<compile_context>
chip_gen: v5e
topology: v5e:2x2
jax: 0.10.0
libtpu: 0.0.40
codegen_flags: <defaults>
</compile_context>

<pallas_src>
import jax
import jax.numpy as jnp
from jax.experimental import pallas as pl
from jax.experimental.pallas import tpu as pltpu


# ------------------- fused conv (GEMM) + bias + broadcast-add kernel -------------------
def fused_conv_bias_add_kernel(w_ref, b_ref, p_ref, other_ref, o_ref):
    # w_ref:     (Cout, KKC)        transposed conv weight
    # b_ref:     (Cout, 1)          bias
    # p_ref:     (KKC, HW)          transposed im2col patches for image n
    # other_ref: (B, 1, Cout, HW)   random tensor slice for image n
    # o_ref:     (B, 1, Cout, HW)   final output slice for image n
    conv = jnp.dot(w_ref[...], p_ref[...],
                   preferred_element_type=jnp.float32) + b_ref[...]   # (Cout, HW)
    o_ref[...] = (other_ref[...] + conv[None, None]).astype(o_ref.dtype)


# ------------------- Model forward -------------------
def model_forward(x1, conv_w, conv_b, other=None, *, key=None):
    N, Cin, H, W = x1.shape
    Cout, _, K, _ = conv_w.shape
    pad = K // 2
    HW = H * W
    KKC = K * K * Cin

    # ---- im2col glue (JAX), transposed so the GEMM output is lane-dense ----
    # patchesT[(dh*K+dw)*Cin+ci, n*HW + h*W + w] = x_padded[n, h+dh, w+dw, ci]
    x_nhwc = jnp.transpose(x1, (0, 2, 3, 1))
    xp = jnp.pad(x_nhwc, ((0, 0), (pad, pad), (pad, pad), (0, 0)))
    cols = [xp[:, dh:dh + H, dw:dw + W, :]
            for dh in range(K) for dw in range(K)]
    patches = jnp.stack(cols, axis=0)                              # (K*K, N, H, W, Cin)
    patchesT = jnp.transpose(patches, (0, 4, 1, 2, 3)).reshape(KKC, N * HW)
    # weight (Cout, Cin, K, K) -> (Cout, K, K, Cin) -> (Cout, K*K*Cin)
    w2dT = jnp.transpose(conv_w, (0, 2, 3, 1)).reshape(Cout, KKC)
    b2d = conv_b.reshape(Cout, 1)

    if other is None:
        if key is None:
            raise ValueError("model_forward: `key` is required when `other` is None")
        # other_shape = [v1.shape[0], *v1.shape]  (mirrors the PyTorch code)
        # TODO(synk): could be generated in-kernel with pltpu.prng_* to skip one
        # HBM pass, but that would not be bit-identical to jax.random.normal.
        other = jax.random.normal(key, (N, N, Cout, H, W), dtype=x1.dtype)
    B = other.shape[0]
    other4 = other.reshape(B, N, Cout, HW)

    assert HW % 128 == 0, "H*W must be a multiple of 128 for lane-dense blocks"

    out = pl.pallas_call(
        fused_conv_bias_add_kernel,
        out_shape=jax.ShapeDtypeStruct((B, N, Cout, HW), x1.dtype),
        grid_spec=pltpu.PrefetchScalarGridSpec(
            num_scalar_prefetch=0,
            grid=(N,),                                            # one step per image
            in_specs=[
                pl.BlockSpec((Cout, KKC), lambda n: (0, 0)),      # weight (resident)
                pl.BlockSpec((Cout, 1), lambda n: (0, 0)),        # bias   (resident)
                pl.BlockSpec((KKC, HW), lambda n: (0, n)),        # patches of image n
                pl.BlockSpec((B, 1, Cout, HW), lambda n: (0, n, 0, 0)),
            ],
            out_specs=pl.BlockSpec((B, 1, Cout, HW), lambda n: (0, n, 0, 0)),
        ),
        compiler_params=pltpu.CompilerParams(
            dimension_semantics=("parallel",)),                   # v7x megacore split
    )(w2dT, b2d, patchesT, other4)

    return out.reshape(B, N, Cout, H, W)


# ------------------- pure-JAX reference (for a sanity check) -------------------
def _reference_forward(x1, conv_w, conv_b, other):
    v1 = jax.lax.conv_general_dilated(
        x1, conv_w, window_strides=(1, 1), padding="SAME",
        dimension_numbers=("NCHW", "OIHW", "NCHW"))
    v1 = v1 + conv_b.reshape(1, -1, 1, 1)
    return v1[None] + other


if __name__ == "__main__":
    key = jax.random.PRNGKey(0)
    k_x, k_w, k_b, k_other = jax.random.split(key, 4)

    # small shapes consistent with the module: N=2, Cin=3, H=W=16, Cout=8, K=5
    N, Cin, H, W = 2, 3, 16, 16
    Cout, K = 8, 5

    x1 = jax.random.normal(k_x, (N, Cin, H, W), dtype=jnp.float32)
    conv_w = jax.random.normal(k_w, (Cout, Cin, K, K), dtype=jnp.float32) * 0.1
    conv_b = jax.random.normal(k_b, (Cout,), dtype=jnp.float32) * 0.1
    other = jax.random.normal(k_other, (N, N, Cout, H, W), dtype=jnp.float32)

    out = jax.jit(model_forward)(x1, conv_w, conv_b, other)
    out = jax.block_until_ready(out)

    assert out.shape == (N, N, Cout, H, W), out.shape
    assert out.dtype == jnp.float32

    ref = _reference_forward(x1, conv_w, conv_b, other)
    max_err = float(jnp.max(jnp.abs(out - ref)))
    assert jnp.allclose(out, ref, atol=5e-2, rtol=5e-2), max_err

    print("KERNEL_OK")
</pallas_src>

<mosaic_0001>
module attributes {stable_mosaic.version = 11 : i64} {
  func.func @fused_conv_bias_add_kernel(%arg0: i32, %arg1: memref<8x75xf32, #tpu.memory_space<vmem>>, %arg2: memref<8x1xf32, #tpu.memory_space<vmem>>, %arg3: memref<75x256xf32, #tpu.memory_space<vmem>>, %arg4: memref<2x1x8x256xf32, #tpu.memory_space<vmem>>, %arg5: memref<2x1x8x256xf32, #tpu.memory_space<vmem>>) attributes {dimension_semantics = [#tpu.dimension_semantics<parallel>], iteration_bounds = array<i64: 2>, scalar_prefetch = 0 : i64, scratch_operands = 0 : i64, tpu.core_type = #tpu.core_type<tc>, window_params = [{pipeline_mode = #tpu.pipeline_mode<synchronous>, transform_indices = @transform_0, window_bounds = array<i64: 8, 75>}, {pipeline_mode = #tpu.pipeline_mode<synchronous>, transform_indices = @transform_1, window_bounds = array<i64: 8, 1>}, {transform_indices = @transform_2, window_bounds = array<i64: 75, 256>}, {transform_indices = @transform_3, window_bounds = array<i64: 2, 1, 8, 256>}, {transform_indices = @transform_4, window_bounds = array<i64: 2, 1, 8, 256>}]} {
    %c0 = arith.constant 0 : index
    %c0_0 = arith.constant 0 : index
    %0 = vector.load %arg1[%c0, %c0_0] : memref<8x75xf32, #tpu.memory_space<vmem>>, vector<8x75xf32>
    %c0_1 = arith.constant 0 : index
    %c0_2 = arith.constant 0 : index
    %1 = vector.load %arg3[%c0_1, %c0_2] : memref<75x256xf32, #tpu.memory_space<vmem>>, vector<75x256xf32>
    %cst = arith.constant dense<0.000000e+00> : vector<8x256xf32>
    %2 = tpu.matmul %0, %1, %cst {dimension_numbers = #tpu.dot_dimension_numbers<[1], [0], [0], [1], [0, 0, 1, 1], [], []>} : vector<8x75xf32>, vector<75x256xf32>, vector<8x256xf32> -> vector<8x256xf32>
    %c0_3 = arith.constant 0 : index
    %c0_4 = arith.constant 0 : index
    %3 = vector.load %arg2[%c0_3, %c0_4] : memref<8x1xf32, #tpu.memory_space<vmem>>, vector<8x1xf32>
    %4 = vector.broadcast %3 : vector<8x1xf32> to vector<8x256xf32>
    %5 = arith.addf %2, %4 : vector<8x256xf32>
    %c0_5 = arith.constant 0 : index
    %c0_6 = arith.constant 0 : index
    %c0_7 = arith.constant 0 : index
    %c0_8 = arith.constant 0 : index
    %6 = vector.load %arg4[%c0_5, %c0_6, %c0_7, %c0_8] : memref<2x1x8x256xf32, #tpu.memory_space<vmem>>, vector<2x1x8x256xf32>
    %7 = vector.shape_cast %5 : vector<8x256xf32> to vector<1x1x8x256xf32>
    %8 = vector.broadcast %7 : vector<1x1x8x256xf32> to vector<2x1x8x256xf32>
    %9 = arith.addf %6, %8 : vector<2x1x8x256xf32>
    %c0_9 = arith.constant 0 : index
    %c0_10 = arith.constant 0 : index
    %c0_11 = arith.constant 0 : index
    %c0_12 = arith.constant 0 : index
    %10 = vector.load %arg5[%c0_9, %c0_10, %c0_11, %c0_12] : memref<2x1x8x256xf32, #tpu.memory_space<vmem>>, vector<2x1x8x256xf32>
    tpu.vector_store %arg5[%c0_9, %c0_10, %c0_11, %c0_12], %9 {strides = array<i32>} : memref<2x1x8x256xf32, #tpu.memory_space<vmem>>, vector<2x1x8x256xf32>,
    return
  }
  func.func @transform_0(%arg0: i32) -> (i32, i32) {
    %c0_i32 = arith.constant 0 : i32
    %c0_i32_0 = arith.constant 0 : i32
    %c0_i32_1 = arith.constant 0 : i32
    return %c0_i32, %c0_i32_0 : i32, i32
  }
  func.func @transform_1(%arg0: i32) -> (i32, i32) {
    %c0_i32 = arith.constant 0 : i32
    %c0_i32_0 = arith.constant 0 : i32
    %c0_i32_1 = arith.constant 0 : i32
    return %c0_i32, %c0_i32_0 : i32, i32
  }
  func.func @transform_2(%arg0: i32) -> (i32, i32) {
    %c0_i32 = arith.constant 0 : i32
    %c0_i32_0 = arith.constant 0 : i32
    return %c0_i32, %arg0 : i32, i32
  }
  func.func @transform_3(%arg0: i32) -> (i32, i32, i32, i32) {
    %c0_i32 = arith.constant 0 : i32
    %c0_i32_0 = arith.constant 0 : i32
    %c0_i32_1 = arith.constant 0 : i32
    %c0_i32_2 = arith.constant 0 : i32
    return %c0_i32, %arg0, %c0_i32_0, %c0_i32_1 : i32, i32, i32, i32
  }
  func.func @transform_4(%arg0: i32) -> (i32, i32, i32, i32) {
    %c0_i32 = arith.constant 0 : i32
    %c0_i32_0 = arith.constant 0 : i32
    %c0_i32_1 = arith.constant 0 : i32
    %c0_i32_2 = arith.constant 0 : i32
    return %c0_i32, %arg0, %c0_i32_0, %c0_i32_1 : i32, i32, i32, i32
  }
}

</mosaic_0001>

<bundles_post_ra>
// kernel: model_forward.1
= control target key start
LH: loop header
LB: loop body
LE: loop exit
PB: predicated region body
PF: predicated region fallthrough
CT: control target
= control target key end

     0   :  { %s596_s15 = smov 0   ;;  %s598_s16 = smov 0   ;;  %s745_s0 = inlined_call_operand.vmem [shape: f32[8,75], index: 0, kind: input, shape index: {}]   ;;  %s746_s1 = inlined_call_operand.vmem [shape: f32[8,1], index: 1, kind: input, shape index: {}]   ;;  %s747_s2 = inlined_call_operand.vmem [shape: f32[75,512], index: 2, kind: input, shape index: {}]   ;;  %s748_s3 = inlined_call_operand.vmem [shape: f32[2,2,8,256], index: 3, kind: input, shape index: {}]   ;;  %s749_s4 = inlined_call_operand.vmem [shape: f32[2,2,8,256], index: 4, kind: output, shape index: {}]  }
   0x1   :  { %s600_s17 = smov 0  }
   0x2 LB: > { %s494_s18 = sadd.s32 4294967295, %s568_s17   ;;  %s613_s19 = sadd.s32 1, %s568_s17   ;;  %s568_s17 = sphi %s600_s17, %s754_s17   ;;  %s564_s16 = sphi %s598_s16, %s753_s16   ;;  %s560_s15 = sphi %s596_s15, %s752_s15  }
   0x3   : > { %s60_s20 = ssub.s32 %s568_s17, %s613_s19  ;;  %s63_s21 = sadd.s32 1, %s564_s16 }
   0x4   : > { %p61_p0 = scmp.eq.s32.totalorder %s60_s20, 0  ;;  %p70_p1 = scmp.ne.s32.totalorder %s564_s16, %s560_s15 }
   0x5   : > { %p71_p2 = scmp.eq.s32.totalorder %s568_s17, 0  ;;  %p126_p3 = scmp.eq.s32.totalorder %s494_s18, 1 }
   0x6   : > { %s624_s22 = scalar_select %p61_p0, %s564_s16, %s63_s21  }
   0x7   : > { %p626_p4 = por %p71_p2, %p70_p1  ;;  %p630_p5 = por %p126_p3, %p70_p1 }
   0x8   : > { %p497_p6 = scmp.ge.s32.totalorder %s568_s17, 2 }
   0xa   : > { %154 = sbr.rel (%p497_p6) target bundleno = 47 (0x2f), region = 24 }
   0xf   : > { %157 = sbr.rel (!%p626_p4) target bundleno = 39 (0x27), region = 28  ;;  %s159_s25 = sand.u32 (%p626_p4), 1, %s564_s16  }
  0x10   : > { %s515_s26 = sshll.u32 (%p626_p4), %s568_s17, 4  ;;  %s518_s27 = smul.u32 (%p626_p4), 160, %s159_s25 }
  0x11   : > { %s642_s30 = scalar_lea.vmem (%p626_p4), %s747_s2, %s515_s26 }
  0x12   : > { %v177_v0 = vld [vmem:[%s642_s30] sm:$0xff] (%p626_p4)  ;;  %v179_v1 = vld [vmem:[%s642_s30 + $0x8] sm:$0xff] (%p626_p4)  ;;  %s647_s5 = scalar_lea.vmem (%p626_p4), [#allocation2], %s518_s27 }
  0x13   : > { %v181_v2 = vld [vmem:[%s642_s30 + $0x20] sm:$0xff] (%p626_p4)  ;;  %178 = vst [vmem:[%s647_s5] sm:$0xff] (%p626_p4), %v177_v0  ;;  %v183_v3 = vld [vmem:[%s642_s30 + $0x28] sm:$0xff] (%p626_p4) }
  0x14   : > { %180 = vst [vmem:[%s647_s5 + $0x8] sm:$0xff] %v179_v1  ;;  %v185_v4 = vld [vmem:[%s642_s30 + $0x40] sm:$0xff]  ;;  %v187_v5 = vld [vmem:[%s642_s30 + $0x48] sm:$0xff] }
  0x15   : > { %182 = vst [vmem:[%s647_s5 + $0x10] sm:$0xff] %v181_v2  ;;  %v189_v6 = vld [vmem:[%s642_s30 + $0x60] sm:$0xff]  ;;  %v191_v7 = vld [vmem:[%s642_s30 + $0x68] sm:$0xff] }
  0x16   : > { %184 = vst [vmem:[%s647_s5 + $0x18] sm:$0xff] %v183_v3  ;;  %v193_v8 = vld [vmem:[%s642_s30 + $0x80] sm:$0xff]  ;;  %v195_v9 = vld [vmem:[%s642_s30 + $0x88] sm:$0xff] }
  0x17   : > { %186 = vst [vmem:[%s647_s5 + $0x20] sm:$0xff] %v185_v4  ;;  %v197_v10 = vld [vmem:[%s642_s30 + $0xa0] sm:$0xff]  ;;  %v199_v11 = vld [vmem:[%s642_s30 + $0xa8] sm:$0xff] }
  0x18   : > { %188 = vst [vmem:[%s647_s5 + $0x28] sm:$0xff] %v187_v5  ;;  %v201_v12 = vld [vmem:[%s642_s30 + $0xc0] sm:$0xff]  ;;  %v203_v13 = vld [vmem:[%s642_s30 + $0xc8] sm:$0xff] }
  0x19   : > { %190 = vst [vmem:[%s647_s5 + $0x30] sm:$0xff] %v189_v6  ;;  %v205_v14 = vld [vmem:[%s642_s30 + $0xe0] sm:$0xff]  ;;  %v207_v15 = vld [vmem:[%s642_s30 + $0xe8] sm:$0xff] }
  0x1a   : > { %192 = vst [vmem:[%s647_s5 + $0x38] sm:$0xff] %v191_v7  ;;  %v209_v16 = vld [vmem:[%s642_s30 + $0x100] sm:$0xff]  ;;  %v211_v17 = vld [vmem:[%s642_s30 + $0x108] sm:$0xff] }
  0x1b   : > { %194 = vst [vmem:[%s647_s5 + $0x40] sm:$0xff] %v193_v8  ;;  %v213_v18 = vld [vmem:[%s642_s30 + $0x120] sm:$0xff]  ;;  %v215_v19 = vld [vmem:[%s642_s30 + $0x128] sm:$0xff] }
  0x1c   : > { %196 = vst [vmem:[%s647_s5 + $0x48] sm:$0xff] %v195_v9 }
  0x1d   : > { %198 = vst [vmem:[%s647_s5 + $0x50] sm:$0xff] %v197_v10 }
  0x1e   : > { %200 = vst [vmem:[%s647_s5 + $0x58] sm:$0xff] %v199_v11 }
  0x1f   : > { %202 = vst [vmem:[%s647_s5 + $0x60] sm:$0xff] %v201_v12 }
  0x20   : > { %204 = vst [vmem:[%s647_s5 + $0x68] sm:$0xff] %v203_v13 }
  0x21   : > { %206 = vst [vmem:[%s647_s5 + $0x70] sm:$0xff] %v205_v14 }
  0x22   : > { %208 = vst [vmem:[%s647_s5 + $0x78] sm:$0xff] %v207_v15 }
  0x23   : > { %210 = vst [vmem:[%s647_s5 + $0x80] sm:$0xff] %v209_v16 }
  0x24   : > { %212 = vst [vmem:[%s647_s5 + $0x88] sm:$0xff] %v211_v17 }
  0x25   : > { %214 = vst [vmem:[%s647_s5 + $0x90] sm:$0xff] %v213_v18 }
  0x26   : > { %216 = vst [vmem:[%s647_s5 + $0x98] sm:$0xff] %v215_v19 }
  0x27 PF: > { %222 = sbr.rel (!%p626_p4) target bundleno = 47 (0x2f), region = 51  ;;  %s224_s6 = sand.u32 (%p626_p4), 1, %s564_s16  }
  0x28   : > { %s516_s7 = sshll.u32 (%p626_p4), %s568_s17, 4  ;;  %s500_s8 = sshll.u32 (%p626_p4), %s224_s6, 5 }
  0x29   : > { %s229_s11 = scalar_lea.vmem (%p626_p4), %s748_s3, %s516_s7  ;;  %s226_s12 = scalar_lea.vmem (%p626_p4), [#allocation3], %s500_s8 }
  0x2a   : > { %v242_v20 = vld [vmem:[%s229_s11] sm:$0xff] (%p626_p4)  ;;  %v244_v21 = vld [vmem:[%s229_s11 + $0x8] sm:$0xff] (%p626_p4) }
  0x2b   : > { %v246_v22 = vld [vmem:[%s229_s11 + $0x20] sm:$0xff] (%p626_p4)  ;;  %243 = vst [vmem:[%s226_s12] sm:$0xff] (%p626_p4), %v242_v20  ;;  %v248_v23 = vld [vmem:[%s229_s11 + $0x28] sm:$0xff] (%p626_p4) }
  0x2c   : > { %245 = vst [vmem:[%s226_s12 + $0x8] sm:$0xff] %v244_v21 }
  0x2d   : > { %247 = vst [vmem:[%s226_s12 + $0x10] sm:$0xff] %v246_v22 }
  0x2e   : > { %249 = vst [vmem:[%s226_s12 + $0x18] sm:$0xff] %v248_v23 }
  0x2f PF: > { %p503_p7 = scmp.ge.s32.totalorder %s568_s17, 1  ;;  %p254_p8 = scmp.lt.s32.totalorder %s568_s17, 3 }
  0x31   : > { %p255_p9 = pnand %p503_p7, %p254_p8 }
  0x32   : > { %s261_s13 = sand.u32 (!%p255_p9), 1, %s560_s15  }
  0x33   : > { %258 = sbr.rel (%p255_p9) target bundleno = 218 (0xda), region = 74  ;;  %s504_s27 = sshll.u32 (!%p255_p9), %s261_s13, 5 }
  0x34   : > { %s519_s21 = smul.u32 (!%p255_p9), 160, %s261_s13  ;;  %s270_s28 = scalar_lea.vmem (!%p255_p9), [#allocation3], %s504_s27 }
  0x35   : > { %s295_s29 = scalar_lea.vmem (!%p255_p9), [#allocation4], %s504_s27 }
  0x36   : > { %s701_s23 = scalar_lea.vmem (!%p255_p9), [#allocation2], %s519_s21 }
  0x38   : > { %v318_v24 = vld [vmem:[%s746_s1] sm:$0xff]  ;;  %v570_v25 = vmov 0   ;;  %vm328_vm0 = vcmask 1042432   ;;  %v316_v26 = vld [vmem:[%s701_s23 + $0x90] sm:$0x7]  ;;  %v315_v29 = vld [vmem:[%s701_s23 + $0x88] sm:$0xff] }
  0x39   : > { %545 = vset.pattern.permute.xlu0 %v570_v25  ;;  %v317_v27 = vld [vmem:[%s701_s23 + $0x98] sm:$0x7]  ;;  %v314_v28 = vld [vmem:[%s701_s23 + $0x80] sm:$0xff]  ;;  %506 = vmatpush.msk.msra.mxu0 %vm328_vm0, %v316_v26  ;;  %v312_v30 = vld [vmem:[%s701_s23 + $0x70] sm:$0xff]  ;;  %vm324_vm1 = vcmask 613376   ;;  %s517_s15 = sshll.u32 (%p630_p5), %s494_s18, 4 }
  0x3a   : > { %321 = vperm.xlu0 %545, %v318_v24   ;;  %508 = vmatpush.msk.msra.mxu1 %vm328_vm0, %v317_v27  ;;  %v313_v31 = vld [vmem:[%s701_s23 + $0x78] sm:$0xff]  ;;  %v310_v32 = vld [vmem:[%s701_s23 + $0x60] sm:$0xff]  ;;  %v311_v33 = vld [vmem:[%s701_s23 + $0x68] sm:$0xff]  ;;  %s396_s6 = scalar_lea.vmem (%p630_p5), %s749_s4, %s517_s15 }
  0x3b   : > { %342 = vmatpush.msra.mxu0 %v314_v28  ;;  %v308_v34 = vld [vmem:[%s701_s23 + $0x50] sm:$0xff]  ;;  %v309_v35 = vld [vmem:[%s701_s23 + $0x58] sm:$0xff]  ;;  %v306_v36 = vld [vmem:[%s701_s23 + $0x40] sm:$0xff] }
  0x3c   : > { %362 = vmatpush.msra.mxu1 %v315_v29  ;;  %v307_v37 = vld [vmem:[%s701_s23 + $0x48] sm:$0xff]  ;;  %v304_v38 = vld [vmem:[%s701_s23 + $0x30] sm:$0xff]  ;;  %v305_v39 = vld [vmem:[%s701_s23 + $0x38] sm:$0xff] }
  0x3d   : > { %343 = vmatpush.msra.mxu0 %v312_v30  ;;  %v302_v40 = vld [vmem:[%s701_s23 + $0x20] sm:$0xff]  ;;  %v303_v41 = vld [vmem:[%s701_s23 + $0x28] sm:$0xff]  ;;  %v300_v42 = vld [vmem:[%s701_s23 + $0x10] sm:$0xff] }
  0x3e   : > { %363 = vmatpush.msra.mxu1 %v313_v31  ;;  %v301_v43 = vld [vmem:[%s701_s23 + $0x18] sm:$0xff]  ;;  %v298_v44 = vld [vmem:[%s701_s23] sm:$0xff]  ;;  %v299_v45 = vld [vmem:[%s701_s23 + $0x8] sm:$0xff] }
  0x3f   : > { %344 = vmatpush.msra.mxu0 %v310_v32  ;;  %v297_v46 = vld [vmem:[%s745_s0] sm:$0xff]  ;;  %v377_v50 = vld [vmem:[%s270_s28 + $0x10] sm:$0xff]  ;;  %v376_v52 = vld [vmem:[%s270_s28 + $0x8] sm:$0xff] }
  0x40   : > { %364 = vmatpush.msra.mxu1 %v311_v33  ;;  %v375_v49 = vld [vmem:[%s270_s28] sm:$0xff]  ;;  %v378_v55 = vld [vmem:[%s270_s28 + $0x18] sm:$0xff] }
  0x41   : > { %345 = vmatpush.msra.mxu0 %v308_v34 }
  0x42   : > { %365 = vmatpush.msra.mxu1 %v309_v35 }
  0x43   : > { %346 = vmatpush.msra.mxu0 %v306_v36 }
  0x44   : > { %366 = vmatpush.msra.mxu1 %v307_v37 }
  0x45   : > { %347 = vmatpush.msra.mxu0 %v304_v38 }
  0x46   : > { %367 = vmatpush.msra.mxu1 %v305_v39 }
  0x47   : > { %348 = vmatpush.msra.mxu0 %v302_v40 }
  0x48   : > { %368 = vmatpush.msra.mxu1 %v303_v41 }
  0x49   : > { %349 = vmatpush.msra.mxu0 %v300_v42 }
  0x4a   : > { %369 = vmatpush.msra.mxu1 %v301_v43 }
  0x4b   : > { %350 = vmatpush.msra.mxu0 %v298_v44 }
  0x4c   : > { %370 = vmatpush.msra.mxu1 %v299_v45  ;;  %507 = vmatmul.msk.f32.vlgmr.msra.gmra.mxu0 %vm324_vm1, %v297_v46 }
  0x4d   : > { %509 = vmatmul.msk.f32.vlgmr.msra.gmra.mxu1 %vm324_vm1, %v297_v46 }
  0xac   : > { %v322_v47 = vpop.permute.xlu0 %321 }
  0xc9   : > { %v352_v48 = vpop.f32.mrf.mxu0 }
  0xca   : > { %v372_v51 = vpop.f32.mrf.mxu1  ;;  %v353_v53 = vadd.f32 %v352_v48, %v322_v47 }
  0xcb   : > { %v373_v54 = vadd.f32 %v372_v51, %v322_v47 }
  0xcc   : > { %v379_v56 = vadd.f32 %v375_v49, %v353_v53  ;;  %v381_v57 = vadd.f32 %v377_v50, %v353_v53 }
  0xcd   : > { %v380_v58 = vadd.f32 %v376_v52, %v373_v54  ;;  %v382_v59 = vadd.f32 %v378_v55, %v373_v54  ;;  %393 = sbr.rel (!%p630_p5) target bundleno = 218 (0xda), region = 86 }
  0xce   : > { %383 = vst [vmem:[%s295_s29] sm:$0xff] %v379_v56 }
  0xcf   : > { %385 = vst [vmem:[%s295_s29 + $0x10] sm:$0xff] %v381_v57 }
  0xd0   : > { %384 = vst [vmem:[%s295_s29 + $0x8] sm:$0xff] %v380_v58 }
  0xd1   : > { %386 = vst [vmem:[%s295_s29 + $0x18] sm:$0xff] %v382_v59 }
  0xd5   : > { %v409_v60 = vld [vmem:[%s295_s29] sm:$0xff] }
  0xd6   : > { %v413_v62 = vld [vmem:[%s295_s29 + $0x10] sm:$0xff]  ;;  %410 = vst [vmem:[%s396_s6] sm:$0xff] %v409_v60 }
  0xd7   : > { %v411_v61 = vld [vmem:[%s295_s29 + $0x8] sm:$0xff]  ;;  %414 = vst [vmem:[%s396_s6 + $0x20] sm:$0xff] %v413_v62 }
  0xd8   : > { %v415_v63 = vld [vmem:[%s295_s29 + $0x18] sm:$0xff]  ;;  %412 = vst [vmem:[%s396_s6 + $0x8] sm:$0xff] %v411_v61 }
  0xd9   : > { %416 = vst [vmem:[%s396_s6 + $0x28] sm:$0xff] %v415_v63 }
  0xda PF: > { %p11_p10 = scmp.ge.s32.totalorder %s613_s19, 4   ;;  %s752_s15 = smov %s564_s16 }
  0xdb   : > { %s753_s16 = smov %s624_s22  ;;  %s754_s17 = smov %s613_s19 }
  0xdc   :  { %13 = sbr.rel (!%p11_p10) target bundleno = 2 (0x2), region = 148 }

</bundles_post_ra>
